<compile_context>
chip_gen: v7x
topology: tpu7x:2x2x1
jax: 0.10.0
libtpu: 0.0.40
codegen_flags: <defaults>
</compile_context>

<pallas_src>
import functools

import jax
import jax.numpy as jnp
from jax import lax
from jax.experimental import pallas as pl
from jax.experimental.pallas import tpu as pltpu


_NT_DIMS = (((1,), (1,)), ((), ()))  # contract last dim of lhs with last dim of rhs


def _softplus(v):
    # Matches torch.nn.Softplus(beta=1, threshold=20): identity above threshold.
    return jnp.where(v > 20.0, v, jnp.log1p(jnp.exp(jnp.minimum(v, 20.0))))


def _round_up(x, m):
    return ((x + m - 1) // m) * m


def barrier_kernel(x_ref,
                   w1_ref, b1_ref,
                   w2_ref, b2_ref,
                   w3_ref, b3_ref,
                   w4t_ref, b4_ref,
                   o_ref):
    x = x_ref[...]                                                     # (tile_r, P*S)

    h = jnp.dot(x, w1_ref[...], preferred_element_type=jnp.float32) + b1_ref[...]
    h = _softplus(h)                                                   # (tile_r, P*H)

    h = jnp.dot(h, w2_ref[...], preferred_element_type=jnp.float32) + b2_ref[...]
    h = _softplus(h)

    h = jnp.dot(h, w3_ref[...], preferred_element_type=jnp.float32) + b3_ref[...]
    h = _softplus(h)

    # Final layer transposed: (P_out, P*H) x (tile_r, P*H)^T -> (P_out, tile_r).
    # Output store is lane-dense (tile_r lanes) instead of a lane-1 masked store.
    z = lax.dot_general(w4t_ref[...], h, _NT_DIMS,
                        preferred_element_type=jnp.float32)
    z = z + b4_ref[0, 0]                                               # scalar bias from SMEM
    o_ref[...] = (1.0 / (1.0 + jnp.exp(-z))).astype(o_ref.dtype)


@functools.partial(jax.jit, static_argnames=("block_rows",))
def barrier_nn_forward(state, params, *, block_rows=256):
    """state: [B, state_size] float32 -> [B, 1] float32."""
    w1, b1, w2, b2, w3, b3, w4, b4 = params
    B, S = state.shape
    H = w1.shape[1]

    # Pack P batch rows onto the 128-lane axis (P*H == 128 when H == 32).
    P = 128 // H if (H <= 128 and 128 % H == 0) else 1
    P_out = max(P, 8)  # sublane-pad the transposed output head to a full vreg height

    # Block-diagonal weights keep packed rows independent; exact (only zeros added).
    eye = jnp.eye(P, dtype=w1.dtype)
    w1p = jnp.kron(eye, w1)                      # (P*S, P*H)
    w2p = jnp.kron(eye, w2)                      # (P*H, P*H)
    w3p = jnp.kron(eye, w3)                      # (P*H, P*H)
    b1p = jnp.tile(b1, (1, P))                   # (1, P*H)
    b2p = jnp.tile(b2, (1, P))
    b3p = jnp.tile(b3, (1, P))
    w4t = jnp.kron(eye, w4.T)                    # (P, P*H) -- transposed final layer
    w4tp = jnp.zeros((P_out, P * H), w4.dtype).at[:P].set(w4t)

    # Batch tiling over packed rows, padded to a whole number of tiles.
    R = pl.cdiv(B, P)
    tile_r = min(block_rows, _round_up(R, 8))
    R_pad = _round_up(R, tile_r)
    B_pad = R_pad * P

    x = jnp.pad(state, ((0, B_pad - B), (0, 0)))
    x = x.reshape(R_pad, P * S)

    _const = lambda i: (0, 0)
    out = pl.pallas_call(
        barrier_kernel,
        out_shape=jax.ShapeDtypeStruct((P_out, R_pad), jnp.float32),
        grid=(R_pad // tile_r,),
        in_specs=[
            pl.BlockSpec((tile_r, P * S), lambda i: (i, 0)),   # state tile
            pl.BlockSpec(w1p.shape, _const),                   # resident weights/biases
            pl.BlockSpec(b1p.shape, _const),
            pl.BlockSpec(w2p.shape, _const),
            pl.BlockSpec(b2p.shape, _const),
            pl.BlockSpec(w3p.shape, _const),
            pl.BlockSpec(b3p.shape, _const),
            pl.BlockSpec(w4tp.shape, _const),
            pl.BlockSpec(memory_space=pltpu.MemorySpace.SMEM),  # scalar output bias
        ],
        out_specs=pl.BlockSpec((P_out, tile_r), lambda i: (0, i)),
        compiler_params=pltpu.CompilerParams(
            dimension_semantics=("parallel",),      # shard batch grid across TCs (v7x)
            vmem_limit_bytes=32 * 1024 * 1024,      # explicit, generous headroom on all gens
        ),
    )(x, w1p, b1p, w2p, b2p, w3p, b3p, w4tp, b4)

    # out[p, r] is the result for batch row r*P + p  ->  (B, 1)
    return out[:P].T.reshape(B_pad, 1)[:B]


def init_params(key, state_size, hidden_size):
    """Deterministic init mirroring BarrierNN.__init__ shapes.

    Layers 0/2/4: kaiming_normal_(fan_in) -> std = sqrt(2/fan_in).
    Final layer + all biases: PyTorch Linear default U(-1/sqrt(fan_in), 1/sqrt(fan_in)).
    Weights stored as [in, out].
    """
    ks = jax.random.split(key, 8)

    def kaiming(k, fan_in, fan_out):
        std = (2.0 / fan_in) ** 0.5
        return std * jax.random.normal(k, (fan_in, fan_out), dtype=jnp.float32)

    def uniform(k, shape, fan_in):
        bound = 1.0 / (fan_in ** 0.5)
        return jax.random.uniform(k, shape, dtype=jnp.float32,
                                  minval=-bound, maxval=bound)

    w1 = kaiming(ks[0], state_size, hidden_size)
    b1 = uniform(ks[1], (1, hidden_size), state_size)
    w2 = kaiming(ks[2], hidden_size, hidden_size)
    b2 = uniform(ks[3], (1, hidden_size), hidden_size)
    w3 = kaiming(ks[4], hidden_size, hidden_size)
    b3 = uniform(ks[5], (1, hidden_size), hidden_size)
    w4 = uniform(ks[6], (hidden_size, 1), hidden_size)
    b4 = uniform(ks[7], (1, 1), hidden_size)
    return (w1, b1, w2, b2, w3, b3, w4, b4)


def reference_forward(state, params):
    w1, b1, w2, b2, w3, b3, w4, b4 = params
    h = jax.nn.softplus(state @ w1 + b1)
    h = jax.nn.softplus(h @ w2 + b2)
    h = jax.nn.softplus(h @ w3 + b3)
    return jax.nn.sigmoid(h @ w4 + b4)


if __name__ == "__main__":
    # Cartpole-like state: state_size=4, hidden_size=32, batch=8.
    state_size, hidden_size, batch = 4, 32, 8

    key = jax.random.PRNGKey(0)
    k_params, k_state = jax.random.split(key)

    params = init_params(k_params, state_size, hidden_size)
    state = jax.random.normal(k_state, (batch, state_size), dtype=jnp.float32)

    out = jax.block_until_ready(barrier_nn_forward(state, params))
    ref = reference_forward(state, params)

    assert out.shape == (batch, 1)
    assert jnp.allclose(out, ref, atol=1e-5, rtol=1e-5), (out, ref)

    print("KERNEL_OK")
</pallas_src>

<mosaic_0001>
module attributes {stable_mosaic.version = 11 : i64} {
  func.func @barrier_kernel(%arg0: i32, %arg1: memref<8x16xf32, #tpu.memory_space<vmem>>, %arg2: memref<16x128xf32, #tpu.memory_space<vmem>>, %arg3: memref<1x128xf32, #tpu.memory_space<vmem>>, %arg4: memref<128x128xf32, #tpu.memory_space<vmem>>, %arg5: memref<1x128xf32, #tpu.memory_space<vmem>>, %arg6: memref<128x128xf32, #tpu.memory_space<vmem>>, %arg7: memref<1x128xf32, #tpu.memory_space<vmem>>, %arg8: memref<8x128xf32, #tpu.memory_space<vmem>>, %arg9: memref<1x1xf32, #tpu.memory_space<smem>>, %arg10: memref<8x8xf32, #tpu.memory_space<vmem>>) attributes {dimension_semantics = [#tpu.dimension_semantics<parallel>], iteration_bounds = array<i64: 1>, scalar_prefetch = 0 : i64, scratch_operands = 0 : i64, tpu.core_type = #tpu.core_type<tc>, window_params = [{transform_indices = @transform_0, window_bounds = array<i64: 8, 16>}, {pipeline_mode = #tpu.pipeline_mode<synchronous>, transform_indices = @transform_1, window_bounds = array<i64: 16, 128>}, {pipeline_mode = #tpu.pipeline_mode<synchronous>, transform_indices = @transform_2, window_bounds = array<i64: 1, 128>}, {pipeline_mode = #tpu.pipeline_mode<synchronous>, transform_indices = @transform_3, window_bounds = array<i64: 128, 128>}, {pipeline_mode = #tpu.pipeline_mode<synchronous>, transform_indices = @transform_4, window_bounds = array<i64: 1, 128>}, {pipeline_mode = #tpu.pipeline_mode<synchronous>, transform_indices = @transform_5, window_bounds = array<i64: 128, 128>}, {pipeline_mode = #tpu.pipeline_mode<synchronous>, transform_indices = @transform_6, window_bounds = array<i64: 1, 128>}, {pipeline_mode = #tpu.pipeline_mode<synchronous>, transform_indices = @transform_7, window_bounds = array<i64: 8, 128>}, {transform_indices = @transform_8, window_bounds = array<i64: 1, 1>}, {transform_indices = @transform_9, window_bounds = array<i64: 8, 8>}]} {
    %c0 = arith.constant 0 : index
    %c0_0 = arith.constant 0 : index
    %0 = vector.load %arg1[%c0, %c0_0] : memref<8x16xf32, #tpu.memory_space<vmem>>, vector<8x16xf32>
    %c0_1 = arith.constant 0 : index
    %c0_2 = arith.constant 0 : index
    %1 = vector.load %arg2[%c0_1, %c0_2] : memref<16x128xf32, #tpu.memory_space<vmem>>, vector<16x128xf32>
    %cst = arith.constant dense<0.000000e+00> : vector<8x128xf32>
    %2 = tpu.matmul %0, %1, %cst {dimension_numbers = #tpu.dot_dimension_numbers<[1], [0], [0], [1], [0, 0, 1, 1], [], []>} : vector<8x16xf32>, vector<16x128xf32>, vector<8x128xf32> -> vector<8x128xf32>
    %c0_3 = arith.constant 0 : index
    %c0_4 = arith.constant 0 : index
    %3 = vector.load %arg3[%c0_3, %c0_4] : memref<1x128xf32, #tpu.memory_space<vmem>>, vector<1x128xf32>
    %4 = vector.broadcast %3 : vector<1x128xf32> to vector<8x128xf32>
    %5 = arith.addf %2, %4 : vector<8x128xf32>
    %cst_5 = arith.constant 2.000000e+01 : f32
    %6 = vector.broadcast %cst_5 : f32 to vector<8x128xf32>
    %7 = arith.cmpf ogt, %5, %6 : vector<8x128xf32>
    %cst_6 = arith.constant 2.000000e+01 : f32
    %8 = vector.broadcast %cst_6 : f32 to vector<8x128xf32>
    %9 = arith.minimumf %5, %8 : vector<8x128xf32>
    %10 = math.exp %9 : vector<8x128xf32>
    %11 = math.log1p %10 : vector<8x128xf32>
    %12 = arith.select %7, %5, %11 : vector<8x128xi1>, vector<8x128xf32>
    %c0_7 = arith.constant 0 : index
    %c0_8 = arith.constant 0 : index
    %13 = vector.load %arg4[%c0_7, %c0_8] : memref<128x128xf32, #tpu.memory_space<vmem>>, vector<128x128xf32>
    %cst_9 = arith.constant dense<0.000000e+00> : vector<8x128xf32>
    %14 = tpu.matmul %12, %13, %cst_9 {dimension_numbers = #tpu.dot_dimension_numbers<[1], [0], [0], [1], [0, 0, 1, 1], [], []>} : vector<8x128xf32>, vector<128x128xf32>, vector<8x128xf32> -> vector<8x128xf32>
    %c0_10 = arith.constant 0 : index
    %c0_11 = arith.constant 0 : index
    %15 = vector.load %arg5[%c0_10, %c0_11] : memref<1x128xf32, #tpu.memory_space<vmem>>, vector<1x128xf32>
    %16 = vector.broadcast %15 : vector<1x128xf32> to vector<8x128xf32>
    %17 = arith.addf %14, %16 : vector<8x128xf32>
    %cst_12 = arith.constant 2.000000e+01 : f32
    %18 = vector.broadcast %cst_12 : f32 to vector<8x128xf32>
    %19 = arith.cmpf ogt, %17, %18 : vector<8x128xf32>
    %cst_13 = arith.constant 2.000000e+01 : f32
    %20 = vector.broadcast %cst_13 : f32 to vector<8x128xf32>
    %21 = arith.minimumf %17, %20 : vector<8x128xf32>
    %22 = math.exp %21 : vector<8x128xf32>
    %23 = math.log1p %22 : vector<8x128xf32>
    %24 = arith.select %19, %17, %23 : vector<8x128xi1>, vector<8x128xf32>
    %c0_14 = arith.constant 0 : index
    %c0_15 = arith.constant 0 : index
    %25 = vector.load %arg6[%c0_14, %c0_15] : memref<128x128xf32, #tpu.memory_space<vmem>>, vector<128x128xf32>
    %cst_16 = arith.constant dense<0.000000e+00> : vector<8x128xf32>
    %26 = tpu.matmul %24, %25, %cst_16 {dimension_numbers = #tpu.dot_dimension_numbers<[1], [0], [0], [1], [0, 0, 1, 1], [], []>} : vector<8x128xf32>, vector<128x128xf32>, vector<8x128xf32> -> vector<8x128xf32>
    %c0_17 = arith.constant 0 : index
    %c0_18 = arith.constant 0 : index
    %27 = vector.load %arg7[%c0_17, %c0_18] : memref<1x128xf32, #tpu.memory_space<vmem>>, vector<1x128xf32>
    %28 = vector.broadcast %27 : vector<1x128xf32> to vector<8x128xf32>
    %29 = arith.addf %26, %28 : vector<8x128xf32>
    %cst_19 = arith.constant 2.000000e+01 : f32
    %30 = vector.broadcast %cst_19 : f32 to vector<8x128xf32>
    %31 = arith.cmpf ogt, %29, %30 : vector<8x128xf32>
    %cst_20 = arith.constant 2.000000e+01 : f32
    %32 = vector.broadcast %cst_20 : f32 to vector<8x128xf32>
    %33 = arith.minimumf %29, %32 : vector<8x128xf32>
    %34 = math.exp %33 : vector<8x128xf32>
    %35 = math.log1p %34 : vector<8x128xf32>
    %36 = arith.select %31, %29, %35 : vector<8x128xi1>, vector<8x128xf32>
    %c0_21 = arith.constant 0 : index
    %c0_22 = arith.constant 0 : index
    %37 = vector.load %arg8[%c0_21, %c0_22] : memref<8x128xf32, #tpu.memory_space<vmem>>, vector<8x128xf32>
    %cst_23 = arith.constant dense<0.000000e+00> : vector<8x8xf32>
    %38 = tpu.matmul %37, %36, %cst_23 {dimension_numbers = #tpu.dot_dimension_numbers<[1], [1], [0], [0], [0, 0, 1, 0], [], []>} : vector<8x128xf32>, vector<8x128xf32>, vector<8x8xf32> -> vector<8x8xf32>
    %c0_24 = arith.constant 0 : index
    %c0_25 = arith.constant 0 : index
    %39 = memref.load %arg9[%c0_24, %c0_25] : memref<1x1xf32, #tpu.memory_space<smem>>
    %40 = vector.broadcast %39 : f32 to vector<8x8xf32>
    %41 = arith.addf %38, %40 : vector<8x8xf32>
    %cst_26 = arith.constant 0.000000e+00 : f32
    %42 = vector.broadcast %cst_26 : f32 to vector<8x8xf32>
    %43 = arith.subf %42, %41 : vector<8x8xf32>
    %44 = math.exp %43 : vector<8x8xf32>
    %cst_27 = arith.constant 1.000000e+00 : f32
    %45 = vector.broadcast %cst_27 : f32 to vector<8x8xf32>
    %46 = arith.addf %45, %44 : vector<8x8xf32>
    %cst_28 = arith.constant 1.000000e+00 : f32
    %47 = vector.broadcast %cst_28 : f32 to vector<8x8xf32>
    %48 = arith.divf %47, %46 : vector<8x8xf32>
    %c0_29 = arith.constant 0 : index
    %c0_30 = arith.constant 0 : index
    %49 = vector.load %arg10[%c0_29, %c0_30] : memref<8x8xf32, #tpu.memory_space<vmem>>, vector<8x8xf32>
    tpu.vector_store %arg10[%c0_29, %c0_30], %48 {strides = array<i32>} : memref<8x8xf32, #tpu.memory_space<vmem>>, vector<8x8xf32>,
    return
  }
  func.func @transform_0(%arg0: i32) -> (i32, i32) {
    %c0_i32 = arith.constant 0 : i32
    %c0_i32_0 = arith.constant 0 : i32
    return %arg0, %c0_i32 : i32, i32
  }
  func.func @transform_1(%arg0: i32) -> (i32, i32) {
    %c0_i32 = arith.constant 0 : i32
    %c0_i32_0 = arith.constant 0 : i32
    %c0_i32_1 = arith.constant 0 : i32
    return %c0_i32, %c0_i32_0 : i32, i32
  }
  func.func @transform_2(%arg0: i32) -> (i32, i32) {
    %c0_i32 = arith.constant 0 : i32
    %c0_i32_0 = arith.constant 0 : i32
    %c0_i32_1 = arith.constant 0 : i32
    return %c0_i32, %c0_i32_0 : i32, i32
  }
  func.func @transform_3(%arg0: i32) -> (i32, i32) {
    %c0_i32 = arith.constant 0 : i32
    %c0_i32_0 = arith.constant 0 : i32
    %c0_i32_1 = arith.constant 0 : i32
    return %c0_i32, %c0_i32_0 : i32, i32
  }
  func.func @transform_4(%arg0: i32) -> (i32, i32) {
    %c0_i32 = arith.constant 0 : i32
    %c0_i32_0 = arith.constant 0 : i32
    %c0_i32_1 = arith.constant 0 : i32
    return %c0_i32, %c0_i32_0 : i32, i32
  }
  func.func @transform_5(%arg0: i32) -> (i32, i32) {
    %c0_i32 = arith.constant 0 : i32
    %c0_i32_0 = arith.constant 0 : i32
    %c0_i32_1 = arith.constant 0 : i32
    return %c0_i32, %c0_i32_0 : i32, i32
  }
  func.func @transform_6(%arg0: i32) -> (i32, i32) {
    %c0_i32 = arith.constant 0 : i32
    %c0_i32_0 = arith.constant 0 : i32
    %c0_i32_1 = arith.constant 0 : i32
    return %c0_i32, %c0_i32_0 : i32, i32
  }
  func.func @transform_7(%arg0: i32) -> (i32, i32) {
    %c0_i32 = arith.constant 0 : i32
    %c0_i32_0 = arith.constant 0 : i32
    %c0_i32_1 = arith.constant 0 : i32
    return %c0_i32, %c0_i32_0 : i32, i32
  }
  func.func @transform_8(%arg0: i32) -> (i32, i32) {
    %c0_i32 = arith.constant 0 : i32
    %c0_i32_0 = arith.constant 0 : i32
    %c0_i32_1 = arith.constant 0 : i32
    return %c0_i32, %c0_i32_0 : i32, i32
  }
  func.func @transform_9(%arg0: i32) -> (i32, i32) {
    %c0_i32 = arith.constant 0 : i32
    %c0_i32_0 = arith.constant 0 : i32
    return %c0_i32, %arg0 : i32, i32
  }
}

</mosaic_0001>

<bundles_post_ra>
// kernel: barrier_nn_forward.1
= control target key start
LH: loop header
LB: loop body
LE: loop exit
PB: predicated region body
PF: predicated region fallthrough
CT: control target
= control target key end

     0   :  { %v625_v0 = vmov 0.0|0.0   ;;  %vm626_vm0 = vmmov 0   ;;  %v627_v3 = vmov 0.0   ;;  %vm43_vm1 = vcmask 130048   ;;  %s827_s1 = inlined_call_operand.vmem [shape: f32[16,128], index: 1, kind: input, shape index: {}]   ;;  %s828_s0 = inlined_call_operand.vmem [shape: f32[8,16], index: 0, kind: input, shape index: {}]   ;;  %s829_s3 = inlined_call_operand.vmem [shape: f32[128,128], index: 3, kind: input, shape index: {}]   ;;  %s830_s2 = inlined_call_operand.vmem [shape: f32[1,128], index: 2, kind: input, shape index: {}]   ;;  %s831_s5 = inlined_call_operand.vmem [shape: f32[128,128], index: 5, kind: input, shape index: {}]   ;;  %s832_s4 = inlined_call_operand.vmem [shape: f32[1,128], index: 4, kind: input, shape index: {}]   ;;  %s833_s6 = inlined_call_operand.vmem [shape: f32[1,128], index: 6, kind: input, shape index: {}]   ;;  %s834_s7 = inlined_call_operand.vmem [shape: f32[8,128], index: 7, kind: input, shape index: {}]   ;;  %s835_s8 = inlined_call_operand.<no memory space> [shape: f32[1,1], index: 8, kind: input, shape index: {}]   ;;  %s836_s9 = inlined_call_operand.vmem [shape: f32[8,8], index: 9, kind: output, shape index: {}]  }
   0x1   :  { %555 = vmatprep.subr.bf16.mxu0 %v625_v0  ;;  %v34_v1 = vld [vmem:[%s827_s1] sm:$0xff]  ;;  %v35_v2 = vld [vmem:[%s827_s1 + $0x8] sm:$0xff]  ;;  %477 = vmatprep.mubr.msk.f32.mxu0 %vm626_vm0, %v627_v3  ;;  %v133_v9 = vld [vmem:[%s829_s3 + $0x10] sm:$0xff]  ;;  %vm424_vm8 = vcmask 64512  }
   0x2   :  { %v556_v4 = vpack.c.bf16 %v35_v2, %v34_v1  ;;  %558 = vmatprep.subr.bf16.mxu1 %v625_v0  ;;  %512 = vmatprep.mubr.msk.f32.mxu1 %vm626_vm0, %v627_v3  ;;  %v33_v5 = vld [vmem:[%s828_s0] sm:$0xff]  ;;  %v132_v7 = vld [vmem:[%s829_s3 + $0x8] sm:$0xff]  ;;  %v134_v10 = vld [vmem:[%s829_s3 + $0x18] sm:$0xff] }
   0x3   :  { %v131_v6 = vld [vmem:[%s829_s3] sm:$0xff]  ;;  %v562_v11 = vpack.c.bf16 %v134_v10, %v133_v9  ;;  %v136_v13 = vld [vmem:[%s829_s3 + $0x28] sm:$0xff]  ;;  %v137_v15 = vld [vmem:[%s829_s3 + $0x30] sm:$0xff] }
   0x4   :  { %557 = vmatpush3.bf16.msra.mxu0 %v556_v4  ;;  %v559_v8 = vpack.c.bf16 %v132_v7, %v131_v6  ;;  %v135_v12 = vld [vmem:[%s829_s3 + $0x20] sm:$0xff]  ;;  %v138_v16 = vld [vmem:[%s829_s3 + $0x38] sm:$0xff]  ;;  %v140_v19 = vld [vmem:[%s829_s3 + $0x48] sm:$0xff] }
   0x5   :  { %582 = vmatprep.subr.bf16.mxu0 %v625_v0  ;;  %v565_v14 = vpack.c.bf16 %v136_v13, %v135_v12  ;;  %v568_v17 = vpack.c.bf16 %v138_v16, %v137_v15  ;;  %v139_v18 = vld [vmem:[%s829_s3 + $0x40] sm:$0xff]  ;;  %v141_v21 = vld [vmem:[%s829_s3 + $0x50] sm:$0xff]  ;;  %v142_v22 = vld [vmem:[%s829_s3 + $0x58] sm:$0xff] }
   0x6   :  { %560 = vmatpush3.bf16.msra.mxu1 %v559_v8  ;;  %v571_v20 = vpack.c.bf16 %v140_v19, %v139_v18  ;;  %v574_v23 = vpack.c.bf16 %v142_v22, %v141_v21  ;;  %v143_v24 = vld [vmem:[%s829_s3 + $0x60] sm:$0xff]  ;;  %v144_v25 = vld [vmem:[%s829_s3 + $0x68] sm:$0xff]  ;;  %v145_v27 = vld [vmem:[%s829_s3 + $0x70] sm:$0xff] }
   0x7   :  { %478 = vmatmul.mubr.msk.f32.vlgmr.msra.gmra.mrb[0].mxu0 %vm43_vm1, %v33_v5  ;;  %561 = vmatprep.subr.bf16.mxu1 %v625_v0  ;;  %v577_v26 = vpack.c.bf16 %v144_v25, %v143_v24  ;;  %v146_v28 = vld [vmem:[%s829_s3 + $0x78] sm:$0xff]  ;;  %v430_v30 = vld [vmem:[%s830_s2] ss:$0 sm:$0xff]  ;;  %v239_v47 = vld [vmem:[%s831_s5 + $0x8] sm:$0xff] }
   0x8   :  { %547 = vmatprep.mubr.msk.f32.mxu0 %vm626_vm0, %v627_v3  ;;  %v580_v29 = vpack.c.bf16 %v146_v28, %v145_v27  ;;  %v238_v46 = vld [vmem:[%s831_s5] sm:$0xff]  ;;  %v240_v49 = vld [vmem:[%s831_s5 + $0x10] sm:$0xff]  ;;  %v241_v50 = vld [vmem:[%s831_s5 + $0x18] sm:$0xff] }
   0x9   :  { %v583_v48 = vpack.c.bf16 %v239_v47, %v238_v46  ;;  %v586_v51 = vpack.c.bf16 %v241_v50, %v240_v49  ;;  %v242_v52 = vld [vmem:[%s831_s5 + $0x20] sm:$0xff]  ;;  %v243_v53 = vld [vmem:[%s831_s5 + $0x28] sm:$0xff]  ;;  %v244_v55 = vld [vmem:[%s831_s5 + $0x30] sm:$0xff] }
   0xa   :  { %563 = vmatpush3.bf16.msra.mxu1 %v562_v11  ;;  %v589_v54 = vpack.c.bf16 %v243_v53, %v242_v52  ;;  %v245_v56 = vld [vmem:[%s831_s5 + $0x38] sm:$0xff]  ;;  %v246_v58 = vld [vmem:[%s831_s5 + $0x40] sm:$0xff]  ;;  %v247_v59 = vld [vmem:[%s831_s5 + $0x48] sm:$0xff] }
   0xb   :  { %564 = vmatprep.subr.bf16.mxu1 %v625_v0  ;;  %584 = vmatpush3.bf16.msra.mxu0 %v583_v48  ;;  %v592_v57 = vpack.c.bf16 %v245_v56, %v244_v55  ;;  %v595_v60 = vpack.c.bf16 %v247_v59, %v246_v58  ;;  %v248_v61 = vld [vmem:[%s831_s5 + $0x50] sm:$0xff]  ;;  %v249_v62 = vld [vmem:[%s831_s5 + $0x58] sm:$0xff]  ;;  %v250_v1 = vld [vmem:[%s831_s5 + $0x60] sm:$0xff] }
   0xc   :  { %585 = vmatprep.subr.bf16.mxu0 %v625_v0  ;;  %v598_v63 = vpack.c.bf16 %v249_v62, %v248_v61  ;;  %v251_v2 = vld [vmem:[%s831_s5 + $0x68] sm:$0xff]  ;;  %v252_v4 = vld [vmem:[%s831_s5 + $0x70] sm:$0xff]  ;;  %v253_v5 = vld [vmem:[%s831_s5 + $0x78] sm:$0xff] }
   0xd   :  { %v604_v6 = vpack.c.bf16 %v253_v5, %v252_v4  ;;  %v432_v7 = vld [vmem:[%s832_s4] ss:$0 sm:$0xff] }
   0xe   :  { %566 = vmatpush3.bf16.msra.mxu1 %v565_v14  ;;  %v433_v22 = vld [vmem:[%s833_s6] ss:$0 sm:$0xff] }
   0xf   :  { %567 = vmatprep.subr.bf16.mxu1 %v625_v0  ;;  %587 = vmatpush3.bf16.msra.mxu0 %v586_v51 }
  0x10   :  { %588 = vmatprep.subr.bf16.mxu0 %v625_v0 }
  0x12   :  { %569 = vmatpush3.bf16.msra.mxu1 %v568_v17 }
  0x13   :  { %570 = vmatprep.subr.bf16.mxu1 %v625_v0  ;;  %590 = vmatpush3.bf16.msra.mxu0 %v589_v54 }
  0x14   :  { %591 = vmatprep.subr.bf16.mxu0 %v625_v0 }
  0x16   :  { %572 = vmatpush3.bf16.msra.mxu1 %v571_v20 }
  0x17   :  { %573 = vmatprep.subr.bf16.mxu1 %v625_v0  ;;  %593 = vmatpush3.bf16.msra.mxu0 %v592_v57 }
  0x18   :  { %594 = vmatprep.subr.bf16.mxu0 %v625_v0 }
  0x1a   :  { %575 = vmatpush3.bf16.msra.mxu1 %v574_v23 }
  0x1b   :  { %576 = vmatprep.subr.bf16.mxu1 %v625_v0  ;;  %596 = vmatpush3.bf16.msra.mxu0 %v595_v60 }
  0x1c   :  { %597 = vmatprep.subr.bf16.mxu0 %v625_v0 }
  0x1e   :  { %578 = vmatpush3.bf16.msra.mxu1 %v577_v26 }
  0x1f   :  { %579 = vmatprep.subr.bf16.mxu1 %v625_v0  ;;  %599 = vmatpush3.bf16.msra.mxu0 %v598_v63 }
  0x20   :  { %600 = vmatprep.subr.bf16.mxu0 %v625_v0 }
  0x22   :  { %581 = vmatpush3.bf16.msra.mxu1 %v580_v29 }
  0x23   :  { %550 = vmatprep.subr.mxu1 %v627_v3 }
  0xda   :  { %v113_v31 = vpop.f32.mrb[0].mxu0 }
  0xdb   :  { %v114_v32 = vadd.f32 %v430_v30, %v113_v31  ;;  %v479_v33 = vpop.f32.mrb[1].mxu0 }
  0xdd   :  { %v118_v34 = vmin.f32 %v114_v32, 20.0  ;;  %vm117_vm3 = vcmp.gt.f32.partialorder %v114_v32, 20.0 }
  0xdf   :  { %v119_v35 = vmul.f32 1.442695, %v118_v34 }
  0xe1   :  { %609 = vpow2.f32 %v119_v35 }
  0xeb   :  { %v610_v36 = vpop.eup %609 }
  0xec   :  { %v121_v37 = vadd.f32 1.0, %v610_v36  ;;  %v124_v38 = vmul.f32 -0.5, %v610_v36  ;;  %v127_v40 = vand.u32 2147483647, %v610_v36 }
  0xee   :  { %611 = vlog2.f32 %v121_v37  ;;  %v125_v39 = vadd.f32 1.0, %v124_v38  ;;  %vm128_vm2 = vcmp.lt.f32.partialorder %v127_v40, 0.0004427343  ;;  %v345_v38 = vld [vmem:[%s834_s7] sm:$0xff] }
  0xf0   :  { %v126_v43 = vmul.f32 %v610_v36, %v125_v39  ;;  %v347_v39 = vstv %s835_s8 }
  0xf8   :  { %v612_v41 = vpop.eup %611 }
  0xf9   :  { %v123_v42 = vmul.f32 0.6931472, %v612_v41 }
  0xfb   :  { %v129_v44 = vsel %vm128_vm2, %v126_v43, %v123_v42 }
  0xfc   :  { %v130_v45 = vsel %vm117_vm3, %v114_v32, %v129_v44 }
  0xfd   :  { %513 = vmatmul.mubr.f32.vlgmr.msra.gmra.mrb[0].mxu1 %v130_v45 }
  0xfe   :  { %552 = vmatprep.mubr.msk.f32.mxu1 %vm626_vm0, %v627_v3  ;;  %v601_v3 = vpack.c.bf16 %v251_v2, %v250_v1 }
 0x100   :  { %602 = vmatpush3.bf16.msra.mxu0 %v601_v3 }
 0x101   :  { %603 = vmatprep.subr.bf16.mxu0 %v625_v0 }
 0x104   :  { %605 = vmatpush3.bf16.msra.mxu0 %v604_v6 }
 0x1d0   :  { %v220_v8 = vpop.f32.mrb[0].mxu1 }
 0x1d1   :  { %v221_v9 = vadd.f32 %v432_v7, %v220_v8  ;;  %v514_v10 = vpop.f32.mrb[1].mxu1 }
 0x1d3   :  { %v225_v11 = vmin.f32 %v221_v9, 20.0  ;;  %vm224_vm5 = vcmp.gt.f32.partialorder %v221_v9, 20.0 }
 0x1d5   :  { %v226_v12 = vmul.f32 1.442695, %v225_v11 }
 0x1d7   :  { %613 = vpow2.f32 %v226_v12 }
 0x1e1   :  { %v614_v13 = vpop.eup %613 }
 0x1e2   :  { %v228_v14 = vadd.f32 1.0, %v614_v13  ;;  %v231_v15 = vmul.f32 -0.5, %v614_v13  ;;  %v234_v17 = vand.u32 2147483647, %v614_v13 }
 0x1e4   :  { %615 = vlog2.f32 %v228_v14  ;;  %v232_v16 = vadd.f32 1.0, %v231_v15  ;;  %vm235_vm4 = vcmp.lt.f32.partialorder %v234_v17, 0.0004427343 }
 0x1e6   :  { %v233_v0 = vmul.f32 %v614_v13, %v232_v16 }
 0x1ee   :  { %v616_v18 = vpop.eup %615 }
 0x1ef   :  { %v230_v19 = vmul.f32 0.6931472, %v616_v18 }
 0x1f1   :  { %v236_v20 = vsel %vm235_vm4, %v233_v0, %v230_v19 }
 0x1f2   :  { %v237_v21 = vsel %vm224_vm5, %v221_v9, %v236_v20 }
 0x1f3   :  { %548 = vmatmul.mubr.f32.vlgmr.msra.gmra.mrb[2].mxu0 %v237_v21 }
 0x2c6   :  { %v327_v23 = vpop.f32.mrb[2].mxu0 }
 0x2c7   :  { %v328_v24 = vadd.f32 %v433_v22, %v327_v23  ;;  %v549_v25 = vpop.f32.mrb[3].mxu0 }
 0x2c9   :  { %v332_v26 = vmin.f32 %v328_v24, 20.0  ;;  %vm331_vm7 = vcmp.gt.f32.partialorder %v328_v24, 20.0 }
 0x2cb   :  { %v333_v27 = vmul.f32 1.442695, %v332_v26 }
 0x2cd   :  { %617 = vpow2.f32 %v333_v27 }
 0x2d7   :  { %v618_v28 = vpop.eup %617 }
 0x2d8   :  { %v335_v29 = vadd.f32 1.0, %v618_v28  ;;  %v338_v30 = vmul.f32 -0.5, %v618_v28  ;;  %v341_v32 = vand.u32 2147483647, %v618_v28 }
 0x2da   :  { %619 = vlog2.f32 %v335_v29  ;;  %v339_v31 = vadd.f32 1.0, %v338_v30  ;;  %vm342_vm6 = vcmp.lt.f32.partialorder %v341_v32, 0.0004427343 }
 0x2dc   :  { %v340_v35 = vmul.f32 %v618_v28, %v339_v31 }
 0x2e4   :  { %v620_v33 = vpop.eup %619 }
 0x2e5   :  { %v337_v34 = vmul.f32 0.6931472, %v620_v33 }
 0x2e7   :  { %v343_v36 = vsel %vm342_vm6, %v340_v35, %v337_v34 }
 0x2e8   :  { %v344_v37 = vsel %vm331_vm7, %v328_v24, %v343_v36 }
 0x2e9   :  { %551 = vmatpush3.xpose.msra.mxu1 %v344_v37 }
 0x2ec   :  { %553 = vmatmul.mubr.f32.vlgmr.msra.gmra.mrb[2].mxu1 %v345_v38 }
 0x3bf   :  { %v414_v40 = vpop.f32.mrb[2].mxu1 }
 0x3c0   :  { %v415_v41 = vadd.f32 %v414_v40, %v347_v39  ;;  %v554_v42 = vpop.f32.mrb[3].mxu1 }
 0x3c2   :  { %v418_v43 = vsub.f32 0.0, %v415_v41 }
 0x3c4   :  { %v419_v44 = vmul.f32 1.442695, %v418_v43 }
 0x3c6   :  { %621 = vpow2.f32 %v419_v44 }
 0x3d0   :  { %v622_v45 = vpop.eup %621 }
 0x3d1   :  { %v421_v46 = vadd.f32 1.0, %v622_v45 }
 0x3d3   :  { %623 = vrcp.f32 %v421_v46 }
 0x3dd   :  { %v624_v47 = vpop.eup %623 }
 0x3de   :  { %425 = vst.msk [vmem:[%s836_s9] sm:$0xff] %vm424_vm8, %v624_v47 }

</bundles_post_ra>
